<compile_context>
chip_gen: v7x
topology: tpu7x:2x2x1
jax: 0.10.0
libtpu: 0.0.40
codegen_flags: <defaults>
</compile_context>

<pallas_src>
import math

import jax
import jax.numpy as jnp
from jax.experimental import pallas as pl
from jax.experimental.pallas import tpu as pltpu

EPS = 1e-10
CLIP_MAX = 1.0e8

# Lane tile cap (multiple of 128) for pathologically long last dims.
_MAX_LANE_TILE = 8192


def _logspec_kernel(x_ref, o_ref):
    x = x_ref[...]
    # Only fp16 underflows at eps=1e-10; bf16/f32 have the same exponent range.
    if x.dtype == jnp.float16:
        x = x.astype(jnp.float32)
    # clip on the VPU, log on the EUP — both have huge slack under the HBM roofline.
    o_ref[...] = jnp.log(jnp.clip(x, EPS, CLIP_MAX)).astype(o_ref.dtype)


def _hw_block_params():
    """(target_block_bytes, vmem_limit_bytes).

    Conservative (v7x-safe: 64 MiB physical VMEM per TC) unless the chip
    reports >64 MiB VMEM (v5e/v6e: 128 MiB physical)."""
    target, limit = 4 * 1024 * 1024, 32 * 1024 * 1024
    try:
        cap = int(getattr(pltpu.get_tpu_info(), "vmem_capacity_bytes", 0))
        if cap > 64 * 1024 * 1024:
            target, limit = 8 * 1024 * 1024, 64 * 1024 * 1024
    except Exception:
        pass
    return target, limit


def _largest_lane_divisor(n, max_lane=4096):
    """Largest multiple of 128 <= max_lane dividing n, else None."""
    for k in range(max_lane // 128, 0, -1):
        if n % (128 * k) == 0:
            return 128 * k
    return None


def logspec(x: jax.Array) -> jax.Array:
    """Elementwise log(clip(x, 1e-10, 1e8)); any shape, any float dtype.

    Wrapper does only free (contiguous) reshapes — no pad, no output slice."""
    orig_shape = x.shape
    n = int(x.size)
    if n == 0:
        return jnp.log(jnp.clip(x, EPS, CLIP_MAX))

    # Collapse to a 2-D view (pure metadata reshape on a contiguous array).
    if x.ndim >= 2:
        R = int(math.prod(orig_shape[:-1]))
        C = int(orig_shape[-1])
    else:
        R, C = 1, n
    # If the natural lane axis isn't 128-aligned but the flat size has a
    # 128-multiple divisor, re-fold lane-dense (still a free reshape, no pad).
    # Otherwise keep the ragged lane axis and accept masked tail stores —
    # far cheaper than the 2 extra HBM passes of pad + un-pad.
    if C % 128 != 0:
        L = _largest_lane_divisor(n)
        if L is not None:
            R, C = n // L, L
    x2 = x.reshape(R, C)

    itemsize = jnp.dtype(x.dtype).itemsize
    sub = {4: 8, 2: 16, 1: 32}.get(itemsize, 8)  # sublane pack factor
    target_block_bytes, vmem_limit = _hw_block_params()

    # Lane tile: full extent unless pathologically long (then tile in
    # 128-multiples; the last lane block may be ragged -> masked writes).
    ct = C if C <= _MAX_LANE_TILE else _MAX_LANE_TILE
    g_c = pl.cdiv(C, ct)

    # Row tile: multiple of `sub`, sized from the *stored* dtype so 16-bit
    # inputs get blocks as large in bytes as f32 ones.
    if R <= sub:
        rt = R  # block row dim == full array dim (always legal)
    else:
        rt_target = max(sub, (target_block_bytes // (ct * itemsize) // sub) * sub)
        rt = min(rt_target, ((R + sub - 1) // sub) * sub)
        # Prefer an even total number of grid steps: v7x shards the grid across
        # its two TensorCores, so an even split balances the HBM traffic
        # (neutral on single-core v5e/v6e).
        while rt > sub and (pl.cdiv(R, rt) * g_c) % 2 == 1:
            rt -= sub
    g_r = pl.cdiv(R, rt)

    out = pl.pallas_call(
        _logspec_kernel,
        out_shape=jax.ShapeDtypeStruct((R, C), x.dtype),
        grid_spec=pltpu.PrefetchScalarGridSpec(
            num_scalar_prefetch=0,
            grid=(g_r, g_c),
            in_specs=[pl.BlockSpec((rt, ct), lambda i, j: (i, j))],
            out_specs=pl.BlockSpec((rt, ct), lambda i, j: (i, j)),
        ),
        compiler_params=pltpu.CompilerParams(
            dimension_semantics=("parallel", "parallel"),
            vmem_limit_bytes=vmem_limit,
        ),
    )(x2)

    return out.reshape(orig_shape)


if __name__ == "__main__":
    key = jax.random.PRNGKey(0)
    k1, k2, k3, k4 = jax.random.split(key, 4)

    cases = []
    # Lane-aligned spectrogram-like input, with exact zeros (exercises eps clip).
    x1 = jax.random.uniform(k1, (2, 16, 128), dtype=jnp.float32) * 4.0
    x1 = x1.at[:, 0, :].set(0.0)
    cases.append((x1, 1e-6, 1e-6))
    # Non-128-aligned time axis -> ragged-lane path (masked tail stores, no pad).
    x2 = jax.random.uniform(k2, (2, 12, 99), dtype=jnp.float32) * 4.0 + 1e-12
    cases.append((x2, 1e-6, 1e-6))
    # 1-D odd length.
    x3 = jax.random.uniform(k3, (777,), dtype=jnp.float32) * 2.0 + 1e-6
    cases.append((x3, 1e-6, 1e-6))
    # bf16: computed natively in bf16 inside the kernel (no upcast needed).
    x4 = (jax.random.uniform(k4, (4, 12, 99), dtype=jnp.float32) * 4.0
          + 1e-3).astype(jnp.bfloat16)
    cases.append((x4, 5e-2, 1e-1))

    ok = True
    for x, rtol, atol in cases:
        y = jax.block_until_ready(logspec(x))
        y_ref = jnp.log(jnp.clip(x, EPS, CLIP_MAX))
        ok &= (y.shape == x.shape and y.dtype == x.dtype)
        ok &= bool(jnp.allclose(y.astype(jnp.float32), y_ref.astype(jnp.float32),
                                rtol=rtol, atol=atol))

    assert ok
    print("KERNEL_OK")
</pallas_src>

<mosaic_0001>
module attributes {stable_mosaic.version = 11 : i64} {
  func.func @_logspec_kernel(%arg0: i32, %arg1: i32, %arg2: memref<24x128xf32, #tpu.memory_space<vmem>>, %arg3: memref<24x128xf32, #tpu.memory_space<vmem>>) attributes {dimension_semantics = [#tpu.dimension_semantics<parallel>, #tpu.dimension_semantics<parallel>], iteration_bounds = array<i64: 2, 1>, scalar_prefetch = 0 : i64, scratch_operands = 0 : i64, tpu.core_type = #tpu.core_type<tc>, window_params = [{transform_indices = @transform_0, window_bounds = array<i64: 24, 128>}, {transform_indices = @transform_1, window_bounds = array<i64: 24, 128>}]} {
    %c0 = arith.constant 0 : index
    %c0_0 = arith.constant 0 : index
    %0 = vector.load %arg2[%c0, %c0_0] : memref<24x128xf32, #tpu.memory_space<vmem>>, vector<24x128xf32>
    %cst = arith.constant 1.000000e-10 : f32
    %cst_1 = arith.constant 1.000000e+08 : f32
    %1 = vector.broadcast %cst : f32 to vector<24x128xf32>
    %2 = arith.maximumf %1, %0 : vector<24x128xf32>
    %3 = vector.broadcast %cst_1 : f32 to vector<24x128xf32>
    %4 = arith.minimumf %3, %2 : vector<24x128xf32>
    %5 = math.log %4 : vector<24x128xf32>
    %c0_2 = arith.constant 0 : index
    %c0_3 = arith.constant 0 : index
    %6 = vector.load %arg3[%c0_2, %c0_3] : memref<24x128xf32, #tpu.memory_space<vmem>>, vector<24x128xf32>
    tpu.vector_store %arg3[%c0_2, %c0_3], %5 {strides = array<i32>} : memref<24x128xf32, #tpu.memory_space<vmem>>, vector<24x128xf32>,
    return
  }
  func.func @transform_0(%arg0: i32, %arg1: i32) -> (i32, i32) {
    %c0_i32 = arith.constant 0 : i32
    return %arg0, %arg1 : i32, i32
  }
  func.func @transform_1(%arg0: i32, %arg1: i32) -> (i32, i32) {
    %c0_i32 = arith.constant 0 : i32
    return %arg0, %arg1 : i32, i32
  }
}

</mosaic_0001>

<bundles_post_ra>
// kernel: tpu_custom_call.1
= control target key start
LH: loop header
LB: loop body
LE: loop exit
PB: predicated region body
PF: predicated region fallthrough
CT: control target
= control target key end

     0   :  { %6 = vsyncpa [#allocation3], 0  ;;  %s687_s0 = inlined_call_operand.hbm [shape: f32[32,128], index: 0, kind: input, shape index: {}]   ;;  %s688_s1 = inlined_call_operand.hbm [shape: f32[32,128], index: 1, kind: output, shape index: {}]  }
   0x1   :  { %8 = vsyncpa [#allocation3 + $0x1], 0 }
   0x2   :  { %9 = vsyncpa [#allocation4], 0 }
   0x3   :  { %11 = vsyncpa [#allocation4 + $0x1], 0  ;;  %s506_s6 = smov 0   ;;  %s508_s7 = smov 0  }
   0x4   :  { %s510_s8 = smov 0   ;;  %s512_s9 = smov 0  }
   0x5   :  { %s514_s10 = smov 0   ;;  %s516_s11 = smov 0  }
   0x6 LB: > { %s292_s12 = sadd.s32 4294967295, %s488_s11   ;;  %s293_s13 = sadd.s32 4294967294, %s488_s11   ;;  %s488_s11 = sphi %s516_s11, %s17_s11   ;;  %s484_s10 = sphi %s514_s10, %s699_s10   ;;  %s480_s9 = sphi %s512_s9, %s698_s9   ;;  %s476_s8 = sphi %s510_s8, %s697_s8   ;;  %s472_s7 = sphi %s508_s7, %s696_s7   ;;  %s468_s6 = sphi %s506_s6, %s695_s6  }
   0x7   : > { %s29_s14 = sadd.s32 1, %s484_s10  ;;  %s38_s15 = sadd.s32 1, %s476_s8 }
   0x8   : > { %p31_p0 = scmp.ge.s32.totalorder %s29_s14, 2  ;;  %p45_p1 = scmp.ne.s32.totalorder %s476_s8, %s472_s7 }
   0x9   : > { %p46_p2 = scmp.eq.s32.totalorder %s488_s11, 0  ;;  %p51_p3 = scmp.ne.s32.totalorder %s472_s7, %s468_s6 }
   0xa   : > { %s701_s14 = smov (%p31_p0, %s29_s14), 0  ;;  %p52_p5 = scmp.eq.s32.totalorder %s292_s12, 0 }
   0xb   : > { %p47_p4 = por %p46_p2, %p45_p1  ;;  %s33_s16 = ssub.s32 %s484_s10, %s701_s14 }
   0xc   : > { %p77_p6 = scmp.eq.s32.totalorder %s292_s12, 1  ;;  %p36_p7 = scmp.eq.s32.totalorder %s33_s16, 0 }
   0xd   : > { %p549_p8 = por %p52_p5, %p51_p3  ;;  %p83_p10 = scmp.eq.s32.totalorder %s293_s13, 1 }
   0xe   : > { %p553_p9 = por %p77_p6, %p45_p1  ;;  %p689_p12 = scmp.ge.s32.totalorder %s488_s11, 2 }
   0xf   : > { %s558_s19 = scalar_select %p36_p7, %s476_s8, %s38_s15  }
  0x10   : > { %p560_p11 = por %p83_p10, %p51_p3  ;;  %99 = sbr.rel (%p689_p12) target bundleno = 58 (0x3a), region = 16 }
  0x12   : > { %s692_s20 = scalar_select %p560_p11, 1, 0 }
  0x17   : > { %102 = sbr.rel (!%p47_p4) target bundleno = 58 (0x3a), region = 20  ;;  %s103_s21 = sand.u32 (%p47_p4), 1, %s476_s8  }
  0x18   : > { %s108_s22 = smul.u32 (%p47_p4), 3, %s484_s10  ;;  %s572_s27 = scalar_lea.sflag (%p47_p4), [#allocation3], %s103_s21 }
  0x19   : > { %s311_s23 = smul.u32 (%p47_p4), 24, %s103_s21 }
  0x1a   : > { %s109_s24 = ssub.s32 (%p47_p4), 4, %s108_s22 }
  0x1b   : > { %p110_p13 = scmp.lt.s32.totalorder (%p47_p4), %s109_s24, 3  ;;  %s107_s28 = scalar_lea.vmem (%p47_p4), [#allocation2], %s311_s23 }
  0x1e   : > { %s703_s24 = smov (!%p110_p13, %s109_s24), 3 }
  0x1f   : > { %s569_s25 = sshll.u32 %s703_s24, 7 }
  0x20   : > { %s114_s26 = ssub.s32 384, %s569_s25 }
  0x21   : > { %115 = vsyncadd %s572_s27, %s114_s26  ;;  %p297_p0 = scmp.ne.s32.totalorder %s569_s25, 0  ;;  %s309_s29 = smul.u32 384, %s484_s10 }
  0x22   : > { %s121_s30 = sshll.u32 %s107_s28, 4  ;;  %s382_s15 = scalar_lea.hbm %s687_s0, 512  ;;  %s582_s30 = int_to_ptr.vmem [resolvable:$true] %s121_s30 }
  0x23   : > { %s580_s4 = scalar_lea.hbm %s687_s0, %s309_s29 }
  0x24   : > { %s378_s5 = scalar_lea.hbm %s580_s4, %s569_s25  ;;  %p383_p4 = scmp.lt.u32.totalorder %s580_s4, %s687_s0 }
  0x25   : > { %p379_p1 = scmp.ne.s32.totalorder %s580_s4, %s378_s5  ;;  %p384_p5 = scmp.lt.u32.totalorder %s382_s15, %s378_s5 }
  0x26   : > { %p386_p7 = scmp.lt.u32.totalorder %s378_s5, %s580_s4 }
  0x27   : > { %p380_p2 = pnand %p379_p1, %p297_p0  ;;  %p385_p6 = por %p384_p5, %p383_p4 }
  0x29   : > { %p381_p3 = pneg %p380_p2  ;;  %p387_p10 = por %p386_p7, %p385_p6 }
  0x2b   : > { %p388_p13 = pnand %p387_p10, %p381_p3 }
  0x2d   : > { %391 = shalt.err (!%p388_p13)
}
  0x2e   : > { %s392_s22 = scalar_lea.vmem %s582_s30, %s569_s25  ;;  %s490_s23 = smov [#allocation2]  }
  0x2f   : > { %p393_p1 = scmp.ne.s32.totalorder %s582_s30, %s392_s22  ;;  %s396_s24 = sshll.u32 %s490_s23, 4  ;;  %s397_s24 = int_to_ptr.vmem [resolvable:$false] %s396_s24 }
  0x30   : > { %s398_s26 = scalar_lea.vmem %s397_s24, 768  ;;  %p399_p11 = scmp.lt.s32.totalorder %s582_s30, %s397_s24 }
  0x31   : > { %p394_p2 = pnand %p393_p1, %p297_p0  ;;  %p400_p4 = scmp.lt.s32.totalorder %s398_s26, %s392_s22 }
  0x33   : > { %p395_p12 = pneg %p394_p2  ;;  %p401_p5 = por %p400_p4, %p399_p11 }
  0x35   : > { %p402_p6 = pnand %p401_p5, %p395_p12 }
  0x37   : > { %405 = shalt.err (!%p402_p6)
}
  0x38   : > { %s491_s28 = smov 128   ;;  %s492_s29 = smov 8  }
  0x39   : > { %127 = dma.hbm_to_vmem [thread:$0]  (%p297_p0), %s580_s4, %s569_s25, %s582_s30, %s572_s27, %s491_s28, %s491_s28, %s492_s29  }
  0x3a PF: > { %p301_p3 = scmp.ge.s32.totalorder %s488_s11, 1  ;;  %p129_p7 = scmp.lt.s32.totalorder %s488_s11, 3 }
  0x3c   : > { %p130_p10 = pnand %p301_p3, %p129_p7 }
  0x3d   : > { %s612_s2 = sand.u32 (!%p130_p10), 1, %s472_s7  }
  0x3e   : > { %133 = sbr.rel (%p130_p10) target bundleno = 119 (0x77), region = 24  ;;  %s136_s5 = scalar_lea.sflag (!%p130_p10), [#allocation3], %s612_s2 }
  0x3f   : > { %s312_s3 = smul.u32 (!%p130_p10), 24, %s612_s2 }
  0x41   : > { %s139_s12 = scalar_lea.vmem (!%p130_p10), [#allocation2], %s312_s3 }
  0x45   : > { %459 = dma.done.wait (%p549_p8), %s136_s5, 384  }
  0x46   : > { %461 = vsyncadd (%p549_p8), %s136_s5, 4294966912  ;;  %v168_v0 = vld [vmem:[%s139_s12] sm:$0xff]  ;;  %v169_v1 = vld [vmem:[%s139_s12 + $0x8] sm:$0xff]  ;;  %s157_s17 = scalar_lea.vmem [#allocation5], %s312_s3  ;;  %s187_s25 = scalar_lea.sflag [#allocation4], %s612_s2 }
  0x47   : > { %v170_v2 = vld [vmem:[%s139_s12 + $0x10] sm:$0xff]  ;;  %v171_v3 = vmax.f32 %v168_v0, 1e-10  ;;  %v172_v4 = vmax.f32 %v169_v1, 1e-10  ;;  %s194_s27 = smul.u32 (%p553_p9), 3, %s480_s9 }
  0x48   : > { %v173_v5 = vmax.f32 %v170_v2, 1e-10 }
  0x49   : > { %v174_v6 = vmin.f32 %v171_v3, 1e+08  ;;  %v175_v7 = vmin.f32 %v172_v4, 1e+08  ;;  %s195_s30 = ssub.s32 (%p553_p9), 4, %s194_s27 }
  0x4a   : > { %v176_v8 = vmin.f32 %v173_v5, 1e+08  ;;  %p196_p8 = scmp.lt.s32.totalorder (%p553_p9), %s195_s30, 3 }
  0x4b   : > { %372 = vlog2.f32 %v174_v6 }
  0x4c   : > { %374 = vlog2.f32 %v175_v7 }
  0x4d   : > { %376 = vlog2.f32 %v176_v8 }
  0x54   : > { %193 = sbr.rel (!%p553_p9) target bundleno = 119 (0x77), region = 32 }
  0x55   : > { %v373_v9 = vpop.eup %372 }
  0x56   : > { %v375_v10 = vpop.eup %374  ;;  %v178_v11 = vmul.f32 0.6931472, %v373_v9 }
  0x57   : > { %v377_v12 = vpop.eup %376  ;;  %v180_v13 = vmul.f32 0.6931472, %v375_v10 }
  0x58   : > { %183 = vst [vmem:[%s157_s17] sm:$0xff] %v178_v11  ;;  %v182_v14 = vmul.f32 0.6931472, %v377_v12 }
  0x59   : > { %184 = vst [vmem:[%s157_s17 + $0x8] sm:$0xff] %v180_v13 }
  0x5a   : > { %185 = vst [vmem:[%s157_s17 + $0x10] sm:$0xff] %v182_v14 }
  0x5b   : > { %s705_s30 = smov (!%p196_p8, %s195_s30), 3 }
  0x5c   : > { %s624_s4 = sshll.u32 %s705_s30, 7 }
  0x5d   : > { %s200_s13 = ssub.s32 384, %s624_s4 }
  0x5e   : > { %201 = vsyncadd %s187_s25, %s200_s13  ;;  %p303_p11 = scmp.ne.s32.totalorder %s624_s4, 0  ;;  %s310_s15 = smul.u32 384, %s480_s9 }
  0x5f   : > { %s207_s18 = sshll.u32 %s157_s17, 4  ;;  %s493_s24 = smov [#allocation5]   ;;  %s636_s18 = int_to_ptr.vmem [resolvable:$true] %s207_s18 }
  0x60   : > { %s634_s22 = scalar_lea.hbm %s688_s1, %s310_s15  ;;  %s406_s23 = scalar_lea.vmem %s636_s18, %s624_s4 }
  0x61   : > { %p407_p9 = scmp.ne.s32.totalorder %s636_s18, %s406_s23  ;;  %s410_s26 = sshll.u32 %s493_s24, 4  ;;  %s411_s26 = int_to_ptr.vmem [resolvable:$false] %s410_s26 }
  0x62   : > { %s412_s9 = scalar_lea.vmem %s411_s26, 768  ;;  %p413_p13 = scmp.lt.s32.totalorder %s636_s18, %s411_s26 }
  0x63   : > { %p408_p12 = pnand %p407_p9, %p303_p11  ;;  %p414_p1 = scmp.lt.s32.totalorder %s412_s9, %s406_s23 }
  0x65   : > { %p409_p0 = pneg %p408_p12  ;;  %p415_p2 = por %p414_p1, %p413_p13 }
  0x67   : > { %p416_p4 = pnand %p415_p2, %p409_p0 }
  0x69   : > { %419 = shalt.err (!%p416_p4)
}
  0x6a   : > { %s420_s28 = scalar_lea.hbm %s634_s22, %s624_s4  ;;  %s424_s5 = scalar_lea.hbm %s688_s1, 512 }
  0x6b   : > { %p421_p5 = scmp.ne.s32.totalorder %s634_s22, %s420_s28  ;;  %p425_p7 = scmp.lt.u32.totalorder %s634_s22, %s688_s1 }
  0x6c   : > { %p426_p10 = scmp.lt.u32.totalorder %s424_s5, %s420_s28  ;;  %p428_p9 = scmp.lt.u32.totalorder %s420_s28, %s634_s22 }
  0x6d   : > { %p422_p6 = pnand %p421_p5, %p303_p11 }
  0x6e   : > { %p427_p8 = por %p426_p10, %p425_p7 }
  0x6f   : > { %p423_p3 = pneg %p422_p6 }
  0x70   : > { %p429_p12 = por %p428_p9, %p427_p8 }
  0x72   : > { %p430_p0 = pnand %p429_p12, %p423_p3 }
  0x74   : > { %433 = shalt.err (!%p430_p0)
}
  0x75   : > { %s494_s27 = smov 128   ;;  %s495_s30 = smov 8  }
  0x76   : > { %213 = dma.vmem_to_hbm [thread:$0]  (%p303_p11), %s636_s18, %s624_s4, %s634_s22, %s187_s25, %s494_s27, %s494_s27, %s495_s30  }
  0x77 PF: > { %s222_s13 = sand.u32 1, %s468_s6   ;;  %p693_p13 = scmp.ne.s32.totalorder %s692_s20, 0 }
  0x78   : > { %p694_p1 = scmp.ge.s32.totalorder %s488_s11, 2  ;;  %s223_s15 = scalar_lea.sflag [#allocation4], %s222_s13 }
  0x7a   : > { %p316_p2 = pnand %p694_p1, %p693_p13 }
  0x7c   : > { %463 = dma.done.wait (!%p316_p2), %s223_s15, 384  }
  0x7d   : > { %465 = vsyncadd (!%p316_p2), %s223_s15, 4294966912  ;;  %s17_s11 = sadd.s32 1, %s488_s11   ;;  %s695_s6 = smov %s472_s7 }
  0x7e   : > { %p14_p4 = scmp.ge.s32.totalorder %s17_s11, 4   ;;  %s696_s7 = smov %s476_s8 }
  0x7f   : > { %s697_s8 = smov %s558_s19  ;;  %s698_s9 = smov %s484_s10 }
  0x80   : > { %s699_s10 = smov %s701_s14  ;;  %16 = sbr.rel (!%p14_p4) target bundleno = 6 (0x6), region = 69 }
  0x87   :  { %228 = vsyncpa [#allocation3], 1 }
  0x88   :  { %230 = vsyncpa [#allocation3 + $0x1], 1 }
  0x89   :  { %231 = vsyncpa [#allocation4], 1 }
  0x8a   :  { %233 = vsyncpa [#allocation4 + $0x1], 1 }

</bundles_post_ra>
